<compile_context>
chip_gen: v7x
topology: tpu7x:2x2x1
jax: 0.10.0
libtpu: 0.0.40
codegen_flags: <defaults>
</compile_context>

<pallas_src>
import jax
import jax.numpy as jnp
from jax.experimental import pallas as pl
from jax.experimental.pallas import tpu as pltpu


def highway_kernel(x_ref, wp_ref, wg_ref, bp_ref, bg_ref, o_ref):
    # x stays in its native dtype (bf16 inputs hit the fast MXU path);
    # accumulation is f32 via preferred_element_type.
    x = x_ref[...]                                           # (tm, E)

    proj = jnp.dot(x, wp_ref[...], preferred_element_type=jnp.float32)
    proj = jnp.maximum(proj + bp_ref[...], 0.0)              # relu(x @ Wp^T + bp)

    gate = jnp.dot(x, wg_ref[...], preferred_element_type=jnp.float32)
    gate = jax.nn.sigmoid(gate + bg_ref[...])                # sigmoid(x @ Wg^T + bg)

    tn = o_ref.shape[-1]
    E = x_ref.shape[-1]
    if tn == E:
        # Single column block (covers the small-E demo path): no slicing.
        xc = x.astype(jnp.float32)
    else:
        # Column-tiled path (only taken when E % 128 == 0 and tn | E):
        # lane-aligned dynamic slice of the resident x tile.
        j = pl.program_id(1)
        col0 = pl.multiple_of(j * tn, tn)
        xc = x_ref[:, pl.ds(col0, tn)].astype(jnp.float32)

    # gate*proj + (1-gate)*x  ==  x + gate*(proj - x)
    o_ref[...] = (xc + gate * (proj - xc)).astype(o_ref.dtype)


def _cdiv(a, b):
    return -(-a // b)


def _round_up(a, b):
    return (a + b - 1) // b * b


def highway(x, w_proj, b_proj, w_gate, b_gate, *,
            tile_rows=1024, vmem_budget=32 * 1024 * 1024):
    """Highway forward.  x: (..., E); w_*: (E, E) torch-layout (out,in); b_*: (E,)."""
    orig_shape = x.shape
    E = orig_shape[-1]
    x2d = x.reshape(-1, E)
    N = x2d.shape[0]
    dt = x2d.dtype
    itemsize = jnp.dtype(dt).itemsize

    # Pre-transpose once in the wrapper (no in-kernel XLU transpose); weights
    # in the activation dtype (bf16 if the model is bf16), biases in f32 for
    # the f32 epilogue.
    wp_t = w_proj.T.astype(dt)                       # (E, E)
    wg_t = w_gate.T.astype(dt)                       # (E, E)
    bp = b_proj.reshape(1, E).astype(jnp.float32)    # (1, E)
    bg = b_gate.reshape(1, E).astype(jnp.float32)    # (1, E)

    # ---- Column tile: weights stay VMEM-resident; split output columns only
    # when the (double-buffered) weights would blow the VMEM budget.  Splits
    # are lane-aligned (tn % 128 == 0) and exact divisors of E.
    tn = E
    if E % 128 == 0:
        for cand in (E, 1024, 512, 256, 128):
            if E % cand == 0 and 4 * E * cand * itemsize <= vmem_budget // 2:
                tn = cand
                break
        else:
            tn = 128
    n_col = E // tn if E % tn == 0 else _cdiv(E, tn)
    w_vmem = 2 * 2 * E * tn * itemsize               # 2 weights, double-buffered

    # ---- Row tile: multiple of 8 sublanes, >= 2 grid steps when N allows
    # (both v7x TensorCores get work), shrunk until it fits next to weights.
    tm = min(tile_rows, _round_up(_cdiv(N, 2), 8))
    tm = max(tm, 8)

    def _tiles_bytes(t):
        return 2 * t * E * itemsize + 2 * t * tn * itemsize + 2 * tn * 4

    while tm > 8 and w_vmem + _tiles_bytes(tm) > vmem_budget:
        tm = max(8, _round_up(tm // 2, 8))
    n_row = _cdiv(N, tm)

    vmem_limit = int(min(max(w_vmem + _tiles_bytes(tm) + (4 << 20), 16 << 20),
                         100 << 20))

    out = pl.pallas_call(
        highway_kernel,
        out_shape=jax.ShapeDtypeStruct((N, E), dt),
        grid_spec=pl.GridSpec(
            grid=(n_row, n_col),
            in_specs=[
                pl.BlockSpec((tm, E), lambda i, j: (i, 0)),   # x row tile (resident over j)
                pl.BlockSpec((E, tn), lambda i, j: (0, j)),   # W_proj^T column block
                pl.BlockSpec((E, tn), lambda i, j: (0, j)),   # W_gate^T column block
                pl.BlockSpec((1, tn), lambda i, j: (0, j)),   # b_proj
                pl.BlockSpec((1, tn), lambda i, j: (0, j)),   # b_gate
            ],
            out_specs=pl.BlockSpec((tm, tn), lambda i, j: (i, j)),
        ),
        compiler_params=pltpu.CompilerParams(
            dimension_semantics=("parallel", "arbitrary"),
            vmem_limit_bytes=vmem_limit,
        ),
    )(x2d, wp_t, wg_t, bp, bg)

    return out.reshape(orig_shape)


def highway_ref(x, w_proj, b_proj, w_gate, b_gate):
    proj = jax.nn.relu(x @ w_proj.T + b_proj)
    gate = jax.nn.sigmoid(x @ w_gate.T + b_gate)
    return gate * proj + (1.0 - gate) * x


if __name__ == "__main__":
    key = jax.random.PRNGKey(0)
    k_x, k_wp, k_bp, k_wg, k_bg = jax.random.split(key, 5)

    batch, seq, emb = 2, 8, 32          # word_emb_size = 32
    x = jax.random.normal(k_x, (batch, seq, emb), dtype=jnp.float32)

    # Deterministic synthetic parameters (shapes from Highway.__init__)
    scale = 1.0 / jnp.sqrt(emb)
    w_proj = jax.random.uniform(k_wp, (emb, emb), minval=-scale, maxval=scale,
                                dtype=jnp.float32)
    b_proj = jax.random.uniform(k_bp, (emb,), minval=-scale, maxval=scale,
                                dtype=jnp.float32)
    w_gate = jax.random.uniform(k_wg, (emb, emb), minval=-scale, maxval=scale,
                                dtype=jnp.float32)
    b_gate = jax.random.uniform(k_bg, (emb,), minval=-scale, maxval=scale,
                                dtype=jnp.float32)

    out = jax.block_until_ready(highway(x, w_proj, b_proj, w_gate, b_gate))
    ref = highway_ref(x, w_proj, b_proj, w_gate, b_gate)
    assert out.shape == x.shape
    assert jnp.allclose(out, ref, atol=1e-5, rtol=1e-5), "mismatch vs reference"

    # Exercise the ragged-edge (non-tile-multiple N) path: no pad/slice needed.
    N2 = 1030
    x2 = jax.random.normal(k_x, (N2, emb), dtype=jnp.float32)
    out2 = jax.block_until_ready(highway(x2, w_proj, b_proj, w_gate, b_gate))
    ref2 = highway_ref(x2, w_proj, b_proj, w_gate, b_gate)
    assert out2.shape == (N2, emb)
    assert jnp.allclose(out2, ref2, atol=1e-5, rtol=1e-5), "mismatch (ragged path)"

    print("KERNEL_OK")
</pallas_src>

<mosaic_0001>
module attributes {stable_mosaic.version = 11 : i64} {
  func.func @highway_kernel(%arg0: i32, %arg1: i32, %arg2: memref<8x32xf32, #tpu.memory_space<vmem>>, %arg3: memref<32x32xf32, #tpu.memory_space<vmem>>, %arg4: memref<32x32xf32, #tpu.memory_space<vmem>>, %arg5: memref<1x32xf32, #tpu.memory_space<vmem>>, %arg6: memref<1x32xf32, #tpu.memory_space<vmem>>, %arg7: memref<8x32xf32, #tpu.memory_space<vmem>>) attributes {dimension_semantics = [#tpu.dimension_semantics<parallel>, #tpu.dimension_semantics<arbitrary>], iteration_bounds = array<i64: 2, 1>, scalar_prefetch = 0 : i64, scratch_operands = 0 : i64, tpu.core_type = #tpu.core_type<tc>, window_params = [{transform_indices = @transform_0, window_bounds = array<i64: 8, 32>}, {transform_indices = @transform_1, window_bounds = array<i64: 32, 32>}, {transform_indices = @transform_2, window_bounds = array<i64: 32, 32>}, {transform_indices = @transform_3, window_bounds = array<i64: 1, 32>}, {transform_indices = @transform_4, window_bounds = array<i64: 1, 32>}, {transform_indices = @transform_5, window_bounds = array<i64: 8, 32>}]} {
    %c0 = arith.constant 0 : index
    %c0_0 = arith.constant 0 : index
    %0 = vector.load %arg2[%c0, %c0_0] : memref<8x32xf32, #tpu.memory_space<vmem>>, vector<8x32xf32>
    %c0_1 = arith.constant 0 : index
    %c0_2 = arith.constant 0 : index
    %1 = vector.load %arg3[%c0_1, %c0_2] : memref<32x32xf32, #tpu.memory_space<vmem>>, vector<32x32xf32>
    %cst = arith.constant dense<0.000000e+00> : vector<8x32xf32>
    %2 = tpu.matmul %0, %1, %cst {dimension_numbers = #tpu.dot_dimension_numbers<[1], [0], [0], [1], [0, 0, 1, 1], [], []>} : vector<8x32xf32>, vector<32x32xf32>, vector<8x32xf32> -> vector<8x32xf32>
    %c0_3 = arith.constant 0 : index
    %c0_4 = arith.constant 0 : index
    %3 = vector.load %arg5[%c0_3, %c0_4] : memref<1x32xf32, #tpu.memory_space<vmem>>, vector<1x32xf32>
    %4 = vector.broadcast %3 : vector<1x32xf32> to vector<8x32xf32>
    %5 = arith.addf %2, %4 : vector<8x32xf32>
    %cst_5 = arith.constant 0.000000e+00 : f32
    %6 = vector.broadcast %cst_5 : f32 to vector<8x32xf32>
    %7 = arith.maximumf %5, %6 : vector<8x32xf32>
    %c0_6 = arith.constant 0 : index
    %c0_7 = arith.constant 0 : index
    %8 = vector.load %arg4[%c0_6, %c0_7] : memref<32x32xf32, #tpu.memory_space<vmem>>, vector<32x32xf32>
    %cst_8 = arith.constant dense<0.000000e+00> : vector<8x32xf32>
    %9 = tpu.matmul %0, %8, %cst_8 {dimension_numbers = #tpu.dot_dimension_numbers<[1], [0], [0], [1], [0, 0, 1, 1], [], []>} : vector<8x32xf32>, vector<32x32xf32>, vector<8x32xf32> -> vector<8x32xf32>
    %c0_9 = arith.constant 0 : index
    %c0_10 = arith.constant 0 : index
    %10 = vector.load %arg6[%c0_9, %c0_10] : memref<1x32xf32, #tpu.memory_space<vmem>>, vector<1x32xf32>
    %11 = vector.broadcast %10 : vector<1x32xf32> to vector<8x32xf32>
    %12 = arith.addf %9, %11 : vector<8x32xf32>
    %13 = arith.negf %12 : vector<8x32xf32>
    %14 = math.exp %13 : vector<8x32xf32>
    %cst_11 = arith.constant 1.000000e+00 : f32
    %15 = vector.broadcast %cst_11 : f32 to vector<8x32xf32>
    %16 = arith.addf %15, %14 : vector<8x32xf32>
    %17 = arith.divf %15, %16 : vector<8x32xf32>
    %18 = arith.subf %7, %0 : vector<8x32xf32>
    %19 = arith.mulf %17, %18 : vector<8x32xf32>
    %20 = arith.addf %0, %19 : vector<8x32xf32>
    %c0_12 = arith.constant 0 : index
    %c0_13 = arith.constant 0 : index
    %21 = vector.load %arg7[%c0_12, %c0_13] : memref<8x32xf32, #tpu.memory_space<vmem>>, vector<8x32xf32>
    tpu.vector_store %arg7[%c0_12, %c0_13], %20 {strides = array<i32>} : memref<8x32xf32, #tpu.memory_space<vmem>>, vector<8x32xf32>,
    return
  }
  func.func @transform_0(%arg0: i32, %arg1: i32) -> (i32, i32) {
    %c0_i32 = arith.constant 0 : i32
    %c0_i32_0 = arith.constant 0 : i32
    return %arg0, %c0_i32 : i32, i32
  }
  func.func @transform_1(%arg0: i32, %arg1: i32) -> (i32, i32) {
    %c0_i32 = arith.constant 0 : i32
    %c0_i32_0 = arith.constant 0 : i32
    return %c0_i32, %arg1 : i32, i32
  }
  func.func @transform_2(%arg0: i32, %arg1: i32) -> (i32, i32) {
    %c0_i32 = arith.constant 0 : i32
    %c0_i32_0 = arith.constant 0 : i32
    return %c0_i32, %arg1 : i32, i32
  }
  func.func @transform_3(%arg0: i32, %arg1: i32) -> (i32, i32) {
    %c0_i32 = arith.constant 0 : i32
    %c0_i32_0 = arith.constant 0 : i32
    return %c0_i32, %arg1 : i32, i32
  }
  func.func @transform_4(%arg0: i32, %arg1: i32) -> (i32, i32) {
    %c0_i32 = arith.constant 0 : i32
    %c0_i32_0 = arith.constant 0 : i32
    return %c0_i32, %arg1 : i32, i32
  }
  func.func @transform_5(%arg0: i32, %arg1: i32) -> (i32, i32) {
    %c0_i32 = arith.constant 0 : i32
    return %arg0, %arg1 : i32, i32
  }
}

</mosaic_0001>

<bundles_post_ra>
// kernel: tpu_custom_call.1
= control target key start
LH: loop header
LB: loop body
LE: loop exit
PB: predicated region body
PF: predicated region fallthrough
CT: control target
= control target key end

     0   :  { %10 = vsyncpa [#allocation3], 0  ;;  %s1280_s0 = inlined_call_operand.hbm [shape: f32[16,32], index: 0, kind: input, shape index: {}]   ;;  %s1281_s1 = inlined_call_operand.hbm [shape: f32[32,32], index: 1, kind: input, shape index: {}]   ;;  %s1282_s2 = inlined_call_operand.hbm [shape: f32[32,32], index: 2, kind: input, shape index: {}]   ;;  %s1283_s3 = inlined_call_operand.vmem [shape: f32[1,32], index: 3, kind: input, shape index: {}]   ;;  %s1284_s4 = inlined_call_operand.vmem [shape: f32[1,32], index: 4, kind: input, shape index: {}]   ;;  %s1285_s5 = inlined_call_operand.hbm [shape: f32[16,32], index: 5, kind: output, shape index: {}]  }
   0x1   :  { %12 = vsyncpa [#allocation3 + $0x1], 0 }
   0x2   :  { %13 = vsyncpa [#allocation6], 0 }
   0x3   :  { %14 = vsyncpa [#allocation4], 0 }
   0x4   :  { %16 = vsyncpa [#allocation4 + $0x1], 0  ;;  %s1017_s18 = smov 0   ;;  %s1019_s19 = smov 0  }
   0x5   :  { %s1021_s20 = smov 0   ;;  %s1023_s21 = smov 0  }
   0x6   :  { %s1025_s22 = smov 0   ;;  %s1027_s23 = smov 0  }
   0x7 LB: > { %s644_s24 = sadd.s32 4294967295, %s976_s23   ;;  %s645_s25 = sadd.s32 4294967294, %s976_s23   ;;  %s976_s23 = sphi %s1027_s23, %s22_s23   ;;  %s972_s22 = sphi %s1025_s22, %s1307_s22   ;;  %s968_s21 = sphi %s1023_s21, %s1306_s21   ;;  %s964_s20 = sphi %s1021_s20, %s1305_s20   ;;  %s960_s19 = sphi %s1019_s19, %s1304_s19   ;;  %s956_s18 = sphi %s1017_s18, %s1303_s18  }
   0x8   : > { %p54_p0 = scmp.ne.s32.totalorder %s960_s19, %s956_s18  ;;  %p1051_p1 = scmp.eq.s32.totalorder %s644_s24, 0 }
   0x9   : > { %p1055_p2 = scmp.eq.s32.totalorder %s644_s24, 1  ;;  %p190_p3 = scmp.eq.s32.totalorder %s645_s25, 1 }
   0xa   : > { %s1290_s26 = scalar_select %p1051_p1, 1, 0 }
   0xb   : > { %p1061_p4 = por %p1051_p1, %p54_p0  ;;  %p646_p5 = scmp.ge.s32.totalorder %s976_s23, 1 }
   0xc   : > { %p1066_p6 = por %p190_p3, %p54_p0  ;;  %p197_p7 = scmp.lt.s32.totalorder %s976_s23, 3 }
   0xd   : > { %s1292_s28 = scalar_select %p1061_p4, 1, 0 }
   0xe   : > { %s1293_s29 = scalar_select %p1066_p6, 1, 0 }
   0xf   : > { %p1071_p8 = pnand %p646_p5, %p197_p7  ;;  %s978_s6 = smov [#allocation5]  }
  0x10   : > { %s211_s7 = sshll.u32 %s978_s6, 4  ;;  %s979_s9 = smov [#allocation7]   ;;  %s1075_s7 = int_to_ptr.vmem [resolvable:$true] %s211_s7 }
  0x11   : > { %p724_p9 = pneg %p1071_p8  ;;  %s226_s10 = sshll.u32 %s979_s9, 4  ;;  %s1086_s10 = int_to_ptr.vmem [resolvable:$true] %s226_s10 }
  0x12   : > { %s804_s13 = scalar_lea.hbm %s1281_s1, 512 }
  0x13   : > { %p1082_p11 = pnand %p724_p9, %p1051_p1  ;;  %p805_p12 = scmp.ne.s32.totalorder %s1281_s1, %s804_s13 }
  0x14   : > { %p811_p5 = scmp.lt.u32.totalorder %s804_s13, %s1281_s1 }
  0x15   : > { %p806_p13 = pneg %p1082_p11 }
  0x17   : > { %p807_p0 = pnand %p806_p13, %p805_p12 }
  0x19   : > { %p808_p3 = pneg %p807_p0 }
  0x1b   : > { %p813_p7 = pnand %p811_p5, %p808_p3 }
  0x1d   : > { %816 = shalt.err (!%p813_p7)
}
  0x1e   : > { %s817_s24 = scalar_lea.vmem %s1075_s7, 512  ;;  %p825_p1 = scmp.lt.s32.totalorder %s1075_s7, %s1075_s7 }
  0x1f   : > { %p818_p9 = scmp.ne.s32.totalorder %s1075_s7, %s817_s24  ;;  %p826_p12 = scmp.lt.s32.totalorder %s817_s24, %s817_s24 }
  0x21   : > { %p820_p10 = pnand %p818_p9, %p806_p13  ;;  %p827_p0 = por %p826_p12, %p825_p1 }
  0x23   : > { %p821_p6 = pneg %p820_p10 }
  0x25   : > { %p828_p4 = pnand %p827_p0, %p821_p6 }
  0x27   : > { %831 = shalt.err (!%p828_p4)
}
  0x28   : > { %s980_s25 = smov 128   ;;  %s981_s6 = smov 8  }
  0x29   : > { %727 = dma.hbm_to_vmem [thread:$0]  (!%p1082_p11), %s1281_s1, 512, %s1075_s7, [#allocation6], %s980_s25, %s980_s25, %s981_s6  }
  0x2a   : > { %s832_s14 = scalar_lea.hbm %s1282_s2, 512 }
  0x2b   : > { %p833_p1 = scmp.ne.s32.totalorder %s1282_s2, %s832_s14  ;;  %p839_p10 = scmp.lt.u32.totalorder %s832_s14, %s1282_s2 }
  0x2d   : > { %p835_p4 = pnand %p833_p1, %p806_p13 }
  0x2f   : > { %p836_p6 = pneg %p835_p4 }
  0x31   : > { %p841_p3 = pnand %p839_p10, %p836_p6 }
  0x33   : > { %844 = shalt.err (!%p841_p3)
}
  0x34   : > { %s845_s7 = scalar_lea.vmem %s1086_s10, 512  ;;  %p853_p12 = scmp.lt.s32.totalorder %s1086_s10, %s1086_s10 }
  0x35   : > { %p846_p5 = scmp.ne.s32.totalorder %s1086_s10, %s845_s7  ;;  %p854_p0 = scmp.lt.s32.totalorder %s845_s7, %s845_s7 }
  0x37   : > { %p848_p7 = pnand %p846_p5, %p806_p13  ;;  %p855_p1 = por %p854_p0, %p853_p12 }
  0x39   : > { %p849_p9 = pneg %p848_p7 }
  0x3b   : > { %p856_p4 = pnand %p855_p1, %p849_p9 }
  0x3d   : > { %859 = shalt.err (!%p856_p4)
}
  0x3e   : > { %730 = dma.hbm_to_vmem [thread:$0]  (!%p1082_p11), %s1282_s2, 512, %s1086_s10, [#allocation6], %s980_s25, %s980_s25, %s981_s6  }
  0x3f   : > { %s34_s12 = sadd.s32 1, %s972_s22  ;;  %s41_s13 = sadd.s32 1, %s964_s20 }
  0x40   : > { %p36_p13 = scmp.ge.s32.totalorder %s34_s12, 2  ;;  %p48_p6 = scmp.ne.s32.totalorder %s964_s20, %s960_s19 }
  0x41   : > { %p49_p10 = scmp.eq.s32.totalorder %s976_s23, 0  ;;  %p741_p3 = scmp.lt.s32.totalorder %s976_s23, 2 }
  0x42   : > { %s1309_s12 = smov (%p36_p13, %s34_s12), 0  ;;  %p1150_p7 = por %p1055_p2, %p48_p6 }
  0x43   : > { %p50_p5 = por %p49_p10, %p48_p6  ;;  %s38_s14 = ssub.s32 %s972_s22, %s1309_s12 }
  0x44   : > { %s1296_s8 = scalar_select %p1150_p7, 1, 0 }
  0x45   : > { %s252_s15 = sand.u32 1, %s964_s20   ;;  %p39_p9 = scmp.eq.s32.totalorder %s38_s14, 0 }
  0x46   : > { %s652_s10 = sshll.u32 %s252_s15, 3  ;;  %s653_s25 = sshll.u32 %s972_s22, 7 }
  0x47   : > { %s1159_s6 = scalar_select %p39_p9, %s964_s20, %s41_s13  }
  0x48   : > { %s1164_s24 = scalar_lea.hbm %s1280_s0, %s653_s25  ;;  %s256_s27 = scalar_lea.vmem [#allocation2], %s652_s10 }
  0x49   : > { %s263_s7 = sshll.u32 %s256_s27, 4  ;;  %p1168_p2 = pnand %p741_p3, %p50_p5  ;;  %s1172_s7 = int_to_ptr.vmem [resolvable:$true] %s263_s7 }
  0x4a   : > { %s253_s11 = scalar_lea.sflag [#allocation3], %s252_s15  ;;  %s860_s13 = scalar_lea.hbm %s1164_s24, 128 }
  0x4b   : > { %p861_p11 = scmp.ne.s32.totalorder %s1164_s24, %s860_s13  ;;  %p862_p12 = pneg %p1168_p2 }
  0x4c   : > { %s865_s25 = scalar_lea.hbm %s1280_s0, 256  ;;  %p866_p4 = scmp.lt.u32.totalorder %s1164_s24, %s1280_s0 }
  0x4d   : > { %p863_p0 = pnand %p862_p12, %p861_p11  ;;  %p867_p13 = scmp.lt.u32.totalorder %s865_s25, %s860_s13 }
  0x4e   : > { %p869_p10 = scmp.lt.u32.totalorder %s860_s13, %s1164_s24 }
  0x4f   : > { %p864_p1 = pneg %p863_p0  ;;  %p868_p6 = por %p867_p13, %p866_p4 }
  0x51   : > { %p870_p3 = por %p869_p10, %p868_p6 }
  0x53   : > { %p871_p5 = pnand %p870_p3, %p864_p1 }
  0x55   : > { %874 = shalt.err (!%p871_p5)
}
  0x56   : > { %s875_s15 = scalar_lea.vmem %s1172_s7, 128  ;;  %s982_s27 = smov [#allocation2]  }
  0x57   : > { %p876_p9 = scmp.ne.s32.totalorder %s1172_s7, %s875_s15  ;;  %s880_s14 = sshll.u32 %s982_s27, 4  ;;  %s881_s14 = int_to_ptr.vmem [resolvable:$false] %s880_s14 }
  0x58   : > { %s882_s10 = scalar_lea.vmem %s881_s14, 256  ;;  %p883_p7 = scmp.lt.s32.totalorder %s1172_s7, %s881_s14 }
  0x59   : > { %p878_p11 = pnand %p876_p9, %p862_p12  ;;  %p884_p4 = scmp.lt.s32.totalorder %s882_s10, %s875_s15 }
  0x5b   : > { %p879_p0 = pneg %p878_p11  ;;  %p885_p13 = por %p884_p4, %p883_p7 }
  0x5d   : > { %p886_p6 = pnand %p885_p13, %p879_p0 }
  0x5f   : > { %889 = shalt.err (!%p886_p6)
}
  0x60   : > { %734 = dma.hbm_to_vmem [thread:$0]  (!%p1168_p2), %s1164_s24, 128, %s1172_s7, %s253_s11  }
  0x61   : > { %272 = sbr.rel (%p1071_p8) target bundleno = 377 (0x179), region = 40  ;;  %s1202_s13 = sand.u32 (!%p1071_p8), 1, %s960_s19  }
  0x62   : > { %s655_s25 = sshll.u32 (!%p1071_p8), %s1202_s13, 3  ;;  %s275_s16 = scalar_lea.sflag (!%p1071_p8), [#allocation3], %s1202_s13 }
  0x63   : > { %s278_s17 = scalar_lea.vmem (!%p1071_p8), [#allocation2], %s655_s25  ;;  %p1298_p7 = scmp.ne.s32.totalorder (!%p1071_p8), %s1292_s28, 0 }
  0x68   : > { %943 = dma.done.wait (%p1298_p7), %s275_s16, 128  }
  0x69   : > { %945 = vsyncadd (%p1298_p7), %s275_s16, 4294967168  ;;  %p1299_p2 = scmp.ne.s32.totalorder %s1290_s26, 0 }
  0x6b   : > { %947 = dma.done.wait (%p1299_p2), [#allocation6], 1024  }
  0x6c   : > { %949 = vsyncadd (%p1299_p2), [#allocation6], 4294966272  ;;  %v983_v0 = vmov 0.0|0.0   ;;  %vm984_vm0 = vmmov 0   ;;  %v985_v1 = vmov 0.0   ;;  %v412_v2 = vld [vmem:[#allocation7] sm:$0xff] }
  0x6d   : > { %706 = vmatprep.subr.bf16.mxu1 %v983_v0  ;;  %697 = vmatprep.mubr.msk.f32.mxu1 %vm984_vm0, %v985_v1  ;;  %v413_v3 = vld [vmem:[#allocation7 + $0x8] sm:$0xff]  ;;  %v414_v4 = vld [vmem:[#allocation7 + $0x10] sm:$0xff]  ;;  %v415_v6 = vld [vmem:[#allocation7 + $0x18] sm:$0xff]  ;;  %vm337_vm1 = vcmask 261120   ;;  %s665_s7 = sshll.u32 %s968_s21, 7  ;;  %s318_s9 = scalar_lea.vmem [#allocation8], %s655_s25 }
  0x6e   : > { %700 = vmatprep.subr.bf16.mxu0 %v983_v0  ;;  %686 = vmatprep.mubr.msk.f32.mxu0 %vm984_vm0, %v985_v1  ;;  %v707_v5 = vpack.c.bf16 %v413_v3, %v412_v2  ;;  %v326_v7 = vld [vmem:[#allocation5] sm:$0xff]  ;;  %v327_v8 = vld [vmem:[#allocation5 + $0x8] sm:$0xff]  ;;  %v328_v9 = vld [vmem:[#allocation5 + $0x10] sm:$0xff]  ;;  %v710_v11 = vpack.c.bf16 %v415_v6, %v414_v4  ;;  %s518_s11 = sshll.u32 %s318_s9, 4  ;;  %s1230_s14 = scalar_lea.hbm %s1285_s5, %s665_s7  ;;  %s1232_s11 = int_to_ptr.vmem [resolvable:$true] %s518_s11 }
  0x6f   : > { %v329_v10 = vld [vmem:[#allocation5 + $0x18] sm:$0xff]  ;;  %v701_v12 = vpack.c.bf16 %v327_v8, %v326_v7  ;;  %v661_v15 = vld [vmem:[%s1284_s4] ss:$0 sm:$0xff]  ;;  %s504_s10 = scalar_lea.sflag [#allocation4], %s1202_s13  ;;  %s890_s16 = scalar_lea.vmem %s1232_s11, 128 }
  0x70   : > { %708 = vmatpush3.bf16.msra.mxu1 %v707_v5  ;;  %v704_v13 = vpack.c.bf16 %v329_v10, %v328_v9  ;;  %v325_v14 = vld [vmem:[%s278_s17] sm:$0xff]  ;;  %p891_p8 = scmp.ne.s32.totalorder %s1232_s11, %s890_s16  ;;  %p1300_p12 = scmp.ne.s32.totalorder %s1296_s8, 0 }
  0x71   : > { %709 = vmatprep.subr.bf16.mxu1 %v983_v0  ;;  %702 = vmatpush3.bf16.msra.mxu0 %v701_v12  ;;  %v659_v22 = vld [vmem:[%s1283_s3] ss:$0 sm:$0xff]  ;;  %s986_s21 = smov [#allocation8]  }
  0x72   : > { %703 = vmatprep.subr.bf16.mxu0 %v983_v0  ;;  %p892_p1 = pnand %p891_p8, %p1300_p12  ;;  %s894_s25 = sshll.u32 %s986_s21, 4  ;;  %s895_s25 = int_to_ptr.vmem [resolvable:$false] %s894_s25 }
  0x73   : > { %s896_s17 = scalar_lea.vmem %s895_s25, 256  ;;  %p897_p3 = scmp.lt.s32.totalorder %s1232_s11, %s895_s25 }
  0x74   : > { %711 = vmatpush3.bf16.msra.mxu1 %v710_v11  ;;  %p893_p10 = pneg %p892_p1  ;;  %p898_p5 = scmp.lt.s32.totalorder %s896_s17, %s890_s16 }
  0x75   : > { %705 = vmatpush3.bf16.msra.mxu0 %v704_v13 }
  0x76   : > { %p899_p9 = por %p898_p5, %p897_p3 }
  0x77   : > { %698 = vmatmul.mubr.msk.f32.vlgmr.msra.gmra.mrb[0].mxu1 %vm337_vm1, %v325_v14 }
  0x78   : > { %687 = vmatmul.mubr.msk.f32.vlgmr.msra.gmra.mrb[0].mxu0 %vm337_vm1, %v325_v14  ;;  %p900_p11 = pnand %p899_p9, %p893_p10 }
 0x14a   : > { %v489_v16 = vpop.f32.mrb[0].mxu1 }
 0x14b   : > { %v490_v17 = vadd.f32 %v661_v15, %v489_v16  ;;  %v699_v18 = vpop.f32.mrb[1].mxu1  ;;  %v407_v19 = vpop.f32.mrb[0].mxu0 }
 0x14c   : > { %v688_v21 = vpop.f32.mrb[1].mxu0  ;;  %v408_v25 = vadd.f32 %v659_v22, %v407_v19 }
 0x14d   : > { %v663_v20 = vmul.f32 -1.442695, %v490_v17 }
 0x14e   : > { %v411_v26 = vmax.f32 %v408_v25, 0.0 }
 0x14f   : > { %800 = vpow2.f32 %v663_v20 }
 0x150   : > { %v499_v27 = vsub.f32 %v411_v26, %v325_v14 }
 0x159   : > { %v801_v23 = vpop.eup %800 }
 0x15a   : > { %v496_v24 = vadd.f32 1.0, %v801_v23 }
 0x15c   : > { %802 = vrcp.f32 %v496_v24 }
 0x166   : > { %v803_v28 = vpop.eup %802 }
 0x167   : > { %v500_v29 = vmul.f32 %v803_v28, %v499_v27 }
 0x169   : > { %v501_v30 = vadd.f32 %v500_v29, %v325_v14 }
 0x16b   : > { %502 = vst.msk [vmem:[%s318_s9] sm:$0xff] %vm337_vm1, %v501_v30 }
 0x16c   : > { %903 = shalt.err (!%p900_p11)
}
 0x16d   : > { %s904_s13 = scalar_lea.hbm %s1230_s14, 128  ;;  %s908_s30 = scalar_lea.hbm %s1285_s5, 256 }
 0x16e   : > { %p905_p0 = scmp.ne.s32.totalorder %s1230_s14, %s904_s13  ;;  %p909_p6 = scmp.lt.u32.totalorder %s1230_s14, %s1285_s5 }
 0x16f   : > { %p910_p7 = scmp.lt.u32.totalorder %s908_s30, %s904_s13  ;;  %p912_p8 = scmp.lt.u32.totalorder %s904_s13, %s1230_s14 }
 0x170   : > { %p906_p4 = pnand %p905_p0, %p1300_p12 }
 0x171   : > { %p911_p2 = por %p910_p7, %p909_p6 }
 0x172   : > { %p907_p13 = pneg %p906_p4 }
 0x173   : > { %p913_p1 = por %p912_p8, %p911_p2 }
 0x175   : > { %p914_p10 = pnand %p913_p1, %p907_p13 }
 0x177   : > { %917 = shalt.err (!%p914_p10)
}
 0x178   : > { %722 = dma.vmem_to_hbm [thread:$0]  (%p1300_p12), %s1232_s11, 128, %s1230_s14, %s504_s10  }
 0x179 PF: > { %s530_s9 = sand.u32 1, %s956_s18   ;;  %p1301_p3 = scmp.ne.s32.totalorder %s1293_s29, 0 }
 0x17a   : > { %p1302_p5 = scmp.ge.s32.totalorder %s976_s23, 2  ;;  %s531_s15 = scalar_lea.sflag [#allocation4], %s530_s9 }
 0x17c   : > { %p736_p9 = pnand %p1302_p5, %p1301_p3 }
 0x17e   : > { %951 = dma.done.wait (!%p736_p9), %s531_s15, 128  }
 0x17f   : > { %953 = vsyncadd (!%p736_p9), %s531_s15, 4294967168  ;;  %s22_s23 = sadd.s32 1, %s976_s23   ;;  %s1303_s18 = smov %s960_s19 }
 0x180   : > { %p19_p11 = scmp.ge.s32.totalorder %s22_s23, 4   ;;  %s1304_s19 = smov %s964_s20 }
 0x181   : > { %s1305_s20 = smov %s1159_s6  ;;  %s1306_s21 = smov %s972_s22 }
 0x182   : > { %s1307_s22 = smov %s1309_s12  ;;  %21 = sbr.rel (!%p19_p11) target bundleno = 7 (0x7), region = 101 }
 0x189   :  { %536 = vsyncpa [#allocation3], 1 }
 0x18a   :  { %538 = vsyncpa [#allocation3 + $0x1], 1 }
 0x18b   :  { %539 = vsyncpa [#allocation6], 1 }
 0x18c   :  { %540 = vsyncpa [#allocation4], 1 }
 0x18d   :  { %542 = vsyncpa [#allocation4 + $0x1], 1 }

</bundles_post_ra>
